<compile_context>
chip_gen: v5e
topology: v5e:2x2
jax: 0.10.0
libtpu: 0.0.40
codegen_flags: <defaults>
</compile_context>

<pallas_src>
import math

import jax
import jax.numpy as jnp
from jax.experimental import pallas as pl
from jax.experimental.pallas import tpu as pltpu


def _round_up(x, m):
    return (x + m - 1) // m * m


def _cdiv(a, b):
    return (a + b - 1) // b


_MAX_TK = 512       # single-K fast path whenever round_up(Fin, 128) <= 512
_ROW_ALIGN = 16     # sublane-safe row multiple for both f32 (8) and bf16 (16)


def _pick_tk(fin_p):
    """Largest 128-multiple tile <= _MAX_TK that divides fin_p exactly.

    Guarantees K is never padded beyond round_up(Fin, 128)."""
    if fin_p <= _MAX_TK:
        return fin_p
    for cand in range(_MAX_TK, 0, -128):
        if fin_p % cand == 0:
            return cand
    return 128  # unreachable: 128 always divides fin_p


def _pick_tm(n_rows, tm_target):
    """Big row tiles, but keep >= 2 row tiles so v7x megacore can shard."""
    tm = min(tm_target, n_rows)
    if _cdiv(n_rows, tm) < 2 and n_rows >= 2 * _ROW_ALIGN:
        tm = _round_up(_cdiv(n_rows, 2), _ROW_ALIGN)
    return tm


def _linear_kernel_single(x_ref, w_ref, b_ref, o_ref):
    # Single K tile: no accumulator scratch, no branches.  Cast to bf16 once,
    # right before the MXU dot (f32 accumulation via preferred_element_type).
    x = x_ref[...].astype(jnp.bfloat16)
    acc = jnp.dot(x, w_ref[...], preferred_element_type=jnp.float32)
    o_ref[...] = (acc + b_ref[...]).astype(o_ref.dtype)


def _linear_kernel_multi(x_ref, w_ref, b_ref, o_ref, acc_ref):
    k = pl.program_id(1)

    @pl.when(k == 0)
    def _():
        # Fold the bias into the accumulator init (no epilogue add pass).
        acc_ref[...] = jnp.broadcast_to(b_ref[...], acc_ref.shape)

    acc_ref[...] += jnp.dot(
        x_ref[...].astype(jnp.bfloat16), w_ref[...],
        preferred_element_type=jnp.float32,
    )

    @pl.when(k == pl.num_programs(1) - 1)
    def _():
        o_ref[...] = acc_ref[...].astype(o_ref.dtype)


def pallas_linear(x, weight, bias, *, tm=512, out_dtype=jnp.float32):
    """out = x @ weight.T + bias as a tiled Pallas TPU kernel.

    x: [N, Fin] f32, weight: [Fout, Fin] (torch layout), bias: [Fout] f32.
    Pass out_dtype=jnp.bfloat16 to halve output HBM writeback if the consumer
    tolerates it (default f32 matches nn.Linear).
    """
    N, Fin = x.shape
    Fout = weight.shape[0]

    fin_p = _round_up(Fin, 128)
    fout_p = _round_up(Fout, 128)       # lane-dense output -> unmasked vst
    tk = _pick_tk(fin_p)
    n_rows = _round_up(N, _ROW_ALIGN)
    tm = _pick_tm(n_rows, tm)
    n_p = _round_up(n_rows, tm)

    # x path: no extra HBM pad/cast pass when already aligned -- the bf16
    # cast rides the VPU inside the kernel.  If padding is needed, pad
    # directly in bf16 (zero-filled K columns contribute nothing).
    if N == n_p and Fin == fin_p:
        x_in = x
    else:
        x_in = jnp.zeros((n_p, fin_p), jnp.bfloat16).at[:N, :Fin].set(
            x.astype(jnp.bfloat16))

    # Weight / bias are tiny; pad once.  Padded K rows of W^T are zero.
    w_t = jnp.zeros((fin_p, fout_p), jnp.bfloat16).at[:Fin, :Fout].set(
        weight.T.astype(jnp.bfloat16))
    b_p = jnp.zeros((1, fout_p), jnp.float32).at[0, :Fout].set(
        bias.astype(jnp.float32))

    x_bytes = x_in.size * x_in.dtype.itemsize
    out_bytes = n_p * fout_p * jnp.dtype(out_dtype).itemsize
    cost = pl.CostEstimate(
        flops=2 * n_p * fin_p * fout_p,
        transcendentals=0,
        bytes_accessed=x_bytes + w_t.size * 2 + b_p.size * 4 + out_bytes,
    )

    if fin_p == tk:
        # --- Single-K fast path -------------------------------------------
        grid_spec = pltpu.PrefetchScalarGridSpec(
            num_scalar_prefetch=0,
            grid=(n_p // tm,),
            in_specs=[
                pl.BlockSpec((tm, fin_p), lambda i: (i, 0)),       # x tile
                pl.BlockSpec((fin_p, fout_p), lambda i: (0, 0)),   # W^T
                pl.BlockSpec((1, fout_p), lambda i: (0, 0)),       # bias
            ],
            out_specs=pl.BlockSpec((tm, fout_p), lambda i: (i, 0)),
        )
        kernel = _linear_kernel_single
        dim_sem = ("parallel",)
    else:
        # --- Tiled-K path with resident f32 accumulator ---------------------
        grid_spec = pltpu.PrefetchScalarGridSpec(
            num_scalar_prefetch=0,
            grid=(n_p // tm, fin_p // tk),
            in_specs=[
                pl.BlockSpec((tm, tk), lambda i, k: (i, k)),        # x tile
                pl.BlockSpec((tk, fout_p), lambda i, k: (k, 0)),    # W^T tile
                pl.BlockSpec((1, fout_p), lambda i, k: (0, 0)),     # bias
            ],
            out_specs=pl.BlockSpec((tm, fout_p), lambda i, k: (i, 0)),
            scratch_shapes=[pltpu.VMEM((tm, fout_p), jnp.float32)],
        )
        kernel = _linear_kernel_multi
        dim_sem = ("parallel", "arbitrary")

    out_p = pl.pallas_call(
        kernel,
        out_shape=jax.ShapeDtypeStruct((n_p, fout_p), out_dtype),
        grid_spec=grid_spec,
        compiler_params=pltpu.CompilerParams(
            dimension_semantics=dim_sem,
            # Comfortable headroom under v7x's 64 MiB/TC VMEM; tiles here are
            # small (a few MiB double-buffered even at tm=512).
            vmem_limit_bytes=48 * 1024 * 1024,
        ),
        cost_estimate=cost,
    )(x_in, w_t, b_p)

    return out_p[:N, :Fout]


def sgc_forward(x, params, combine, training=False):
    """SGC.forward: returns (output, r_x)."""
    # TODO(synk): training-mode F.dropout(p=0.5) is stochastic; inference
    # semantics (identity, i.e. model.eval()) are implemented here.
    del training
    r_x = x
    if combine == 'cat':
        out = pallas_linear(x, params['W2_w'], params['W2_b'])
    elif combine in ('max', 'ssgc'):
        out = pallas_linear(x, params['W_w'], params['W_b'])
    else:
        raise ValueError(f"unknown combine mode: {combine}")
    return out, r_x


def _mixed_precision_ref(x, w, b):
    """Reference matching the kernel's bf16-operand / f32-accum arithmetic."""
    return (x.astype(jnp.bfloat16).astype(jnp.float32)
            @ w.T.astype(jnp.bfloat16).astype(jnp.float32)) + b


if __name__ == "__main__":
    key = jax.random.PRNGKey(0)
    kx1, kx2, kx3, kx4, kw, kb, kw2, kb2, kw3, kb3 = jax.random.split(key, 10)

    # Small, module-consistent shapes.
    n_nodes, nfeat, nclass, degree = 512, 128, 10, 2
    nfeat_cat = nfeat * (degree + 1)   # W2 input width for combine='cat'

    def linear_init(k_w, k_b, fan_in, fan_out):
        # nn.Linear default init: U(-1/sqrt(fan_in), 1/sqrt(fan_in)).
        s = 1.0 / math.sqrt(fan_in)
        w = jax.random.uniform(k_w, (fan_out, fan_in), jnp.float32, -s, s)
        b = jax.random.uniform(k_b, (fan_out,), jnp.float32, -s, s)
        return w, b

    W_w, W_b = linear_init(kw, kb, nfeat, nclass)
    W2_w, W2_b = linear_init(kw2, kb2, nfeat_cat, nclass)
    params = {'W_w': W_w, 'W_b': W_b, 'W2_w': W2_w, 'W2_b': W2_b}

    # --- SGC forward: both linear heads (single-K fast path, no x padding) ---
    for combine, xk, fin in (('ssgc', kx1, nfeat), ('cat', kx2, nfeat_cat)):
        x = jax.random.normal(xk, (n_nodes, fin), jnp.float32)
        out, r_x = sgc_forward(x, params, combine, training=False)
        out = jax.block_until_ready(out)

        if combine == 'cat':
            w, b = params['W2_w'], params['W2_b']
        else:
            w, b = params['W_w'], params['W_b']

        assert out.shape == (n_nodes, nclass)
        # Tight check vs the kernel's own mixed-precision arithmetic.
        ref_mixed = _mixed_precision_ref(x, w, b)
        assert jnp.allclose(out, ref_mixed, atol=3e-3, rtol=3e-3), combine
        # Loose check vs true f32 nn.Linear semantics (bf16 operand rounding).
        ref_f32 = x @ w.T + b
        assert jnp.allclose(out, ref_f32, atol=5e-2, rtol=5e-2), combine
        # Dropout is identity at inference, so r_x passes x straight through.
        assert r_x is x

    # --- Extra coverage: multi-K tiled reduction path (Fin > 512) ---
    fin_big = 768
    Wb_w, Wb_b = linear_init(kw3, kb3, fin_big, nclass)
    x_big = jax.random.normal(kx3, (n_nodes, fin_big), jnp.float32)
    out_big = jax.block_until_ready(pallas_linear(x_big, Wb_w, Wb_b))
    assert out_big.shape == (n_nodes, nclass)
    assert jnp.allclose(out_big, _mixed_precision_ref(x_big, Wb_w, Wb_b),
                        atol=3e-3, rtol=3e-3)

    # --- Extra coverage: unaligned shapes exercise the padding path ---
    n_odd, fin_odd = 200, 100
    Wo_w, Wo_b = linear_init(kw3, kb3, fin_odd, nclass)
    x_odd = jax.random.normal(kx4, (n_odd, fin_odd), jnp.float32)
    out_odd = jax.block_until_ready(pallas_linear(x_odd, Wo_w, Wo_b))
    assert out_odd.shape == (n_odd, nclass)
    assert jnp.allclose(out_odd, _mixed_precision_ref(x_odd, Wo_w, Wo_b),
                        atol=3e-3, rtol=3e-3)

    print("KERNEL_OK")
</pallas_src>

<mosaic_0001>
module attributes {stable_mosaic.version = 11 : i64} {
  func.func @_linear_kernel_single(%arg0: i32, %arg1: memref<256x128xf32, #tpu.memory_space<vmem>>, %arg2: memref<128x128xbf16, #tpu.memory_space<vmem>>, %arg3: memref<1x128xf32, #tpu.memory_space<vmem>>, %arg4: memref<256x128xf32, #tpu.memory_space<vmem>>) attributes {dimension_semantics = [#tpu.dimension_semantics<parallel>], iteration_bounds = array<i64: 2>, scalar_prefetch = 0 : i64, scratch_operands = 0 : i64, tpu.core_type = #tpu.core_type<tc>, window_params = [{transform_indices = @transform_0, window_bounds = array<i64: 256, 128>}, {pipeline_mode = #tpu.pipeline_mode<synchronous>, transform_indices = @transform_1, window_bounds = array<i64: 128, 128>}, {pipeline_mode = #tpu.pipeline_mode<synchronous>, transform_indices = @transform_2, window_bounds = array<i64: 1, 128>}, {transform_indices = @transform_3, window_bounds = array<i64: 256, 128>}]} {
    %c0 = arith.constant 0 : index
    %c0_0 = arith.constant 0 : index
    %0 = vector.load %arg1[%c0, %c0_0] : memref<256x128xf32, #tpu.memory_space<vmem>>, vector<256x128xf32>
    %1 = arith.truncf %0 : vector<256x128xf32> to vector<256x128xbf16>
    %c0_1 = arith.constant 0 : index
    %c0_2 = arith.constant 0 : index
    %2 = vector.load %arg2[%c0_1, %c0_2] : memref<128x128xbf16, #tpu.memory_space<vmem>>, vector<128x128xbf16>
    %cst = arith.constant dense<0.000000e+00> : vector<256x128xf32>
    %3 = tpu.matmul %1, %2, %cst {dimension_numbers = #tpu.dot_dimension_numbers<[1], [0], [0], [1], [0, 0, 1, 1], [], []>} : vector<256x128xbf16>, vector<128x128xbf16>, vector<256x128xf32> -> vector<256x128xf32>
    %c0_3 = arith.constant 0 : index
    %c0_4 = arith.constant 0 : index
    %4 = vector.load %arg3[%c0_3, %c0_4] : memref<1x128xf32, #tpu.memory_space<vmem>>, vector<1x128xf32>
    %5 = vector.broadcast %4 : vector<1x128xf32> to vector<256x128xf32>
    %6 = arith.addf %3, %5 : vector<256x128xf32>
    %c0_5 = arith.constant 0 : index
    %c0_6 = arith.constant 0 : index
    %7 = vector.load %arg4[%c0_5, %c0_6] : memref<256x128xf32, #tpu.memory_space<vmem>>, vector<256x128xf32>
    tpu.vector_store %arg4[%c0_5, %c0_6], %6 {strides = array<i32>} : memref<256x128xf32, #tpu.memory_space<vmem>>, vector<256x128xf32>,
    return
  }
  func.func @transform_0(%arg0: i32) -> (i32, i32) {
    %c0_i32 = arith.constant 0 : i32
    %c0_i32_0 = arith.constant 0 : i32
    return %arg0, %c0_i32 : i32, i32
  }
  func.func @transform_1(%arg0: i32) -> (i32, i32) {
    %c0_i32 = arith.constant 0 : i32
    %c0_i32_0 = arith.constant 0 : i32
    %c0_i32_1 = arith.constant 0 : i32
    return %c0_i32, %c0_i32_0 : i32, i32
  }
  func.func @transform_2(%arg0: i32) -> (i32, i32) {
    %c0_i32 = arith.constant 0 : i32
    %c0_i32_0 = arith.constant 0 : i32
    %c0_i32_1 = arith.constant 0 : i32
    return %c0_i32, %c0_i32_0 : i32, i32
  }
  func.func @transform_3(%arg0: i32) -> (i32, i32) {
    %c0_i32 = arith.constant 0 : i32
    %c0_i32_0 = arith.constant 0 : i32
    return %arg0, %c0_i32 : i32, i32
  }
}

</mosaic_0001>

<bundles_post_ra>
// kernel: tpu_custom_call.1
= control target key start
LH: loop header
LB: loop body
LE: loop exit
PB: predicated region body
PF: predicated region fallthrough
CT: control target
= control target key end

     0   :  { %8 = vsyncpa [#allocation3], 0  ;;  %s1101_s0 = inlined_call_operand.hbm [shape: f32[512,128], index: 0, kind: input, shape index: {}]   ;;  %s1102_s1 = inlined_call_operand.hbm [shape: bf16[128,128], index: 1, kind: input, shape index: {}]   ;;  %s1103_s2 = inlined_call_operand.vmem [shape: f32[1,128], index: 2, kind: input, shape index: {}]   ;;  %s1104_s3 = inlined_call_operand.hbm [shape: f32[512,128], index: 3, kind: output, shape index: {}]  }
   0x1   :  { %10 = vsyncpa [#allocation3 + $0x1], 0 }
   0x2   :  { %11 = vsyncpa [#allocation6], 0 }
   0x3   :  { %12 = vsyncpa [#allocation4], 0 }
   0x4   :  { %14 = vsyncpa [#allocation4 + $0x1], 0  ;;  %s851_s12 = smov 0   ;;  %s853_s13 = smov 0  }
   0x5   :  { %s855_s14 = smov 0   ;;  %s857_s15 = smov 0  }
   0x6 LB: > { %s872_s16 = sadd.s32 4294967295, %s822_s15   ;;  %s546_s17 = sadd.s32 4294967294, %s822_s15   ;;  %s822_s15 = sphi %s857_s15, %s1114_s15   ;;  %s818_s14 = sphi %s855_s14, %s1113_s14   ;;  %s814_s13 = sphi %s853_s13, %s1112_s13   ;;  %s810_s12 = sphi %s851_s12, %s1111_s12  }
   0x7   : > { %p40_p0 = scmp.ne.s32.totalorder %s814_s13, %s810_s12  ;;  %p41_p1 = scmp.eq.s32.totalorder %s872_s16, 0 }
   0x8   : > { %p106_p2 = scmp.eq.s32.totalorder %s872_s16, 1  ;;  %p112_p3 = scmp.eq.s32.totalorder %s546_s17, 1 }
   0x9   : > { %p881_p4 = por %p41_p1, %p40_p0  ;;  %p547_p5 = scmp.ge.s32.totalorder %s822_s15, 1 }
   0xa   : > { %p886_p6 = por %p112_p3, %p40_p0  ;;  %p119_p7 = scmp.lt.s32.totalorder %s822_s15, 3 }
   0xb   : > { %s130_s22 = sshll.u32 %s1102_s1, 4  ;;  %s824_s24 = smov [#allocation5]   ;;  %s131_s22 = int_to_ptr.hbm [resolvable:$true] %s130_s22 }
   0xc   : > { %p894_p8 = pnand %p547_p5, %p119_p7  ;;  %s132_s25 = sshll.u32 %s824_s24, 4  ;;  %s133_s25 = int_to_ptr.vmem [resolvable:$true] %s132_s25 }
   0xd   : > { %s904_s26 = sadd.s32 1, %s822_s15   ;;  %s825_s27 = smov 64  }
   0xe   : > { %p636_p9 = pneg %p894_p8  ;;  %s826_s28 = smov 4  }
   0xf   : > { %s24_s29 = ssub.s32 %s822_s15, %s904_s26  ;;  %s27_s30 = sadd.s32 1, %s818_s14 }
  0x10   : > { %p637_p10 = pnand %p636_p9, %p41_p1  ;;  %p25_p12 = scmp.eq.s32.totalorder %s24_s29, 0 }
  0x11   : > { %p34_p13 = scmp.ne.s32.totalorder %s818_s14, %s814_s13  ;;  %p35_p0 = scmp.eq.s32.totalorder %s822_s15, 0 }
  0x12   : > { %639 = dma.hbm_to_vmem [thread:$0]  (!%p637_p10), %s131_s22, 1024, %s133_s25, [#allocation6], %s825_s27, %s825_s27, %s826_s28  }
  0x13   : > { %p649_p3 = scmp.lt.s32.totalorder %s822_s15, 2  ;;  %p36_p5 = por %p35_p0, %p34_p13 }
  0x14   : > { %s914_s4 = scalar_select %p25_p12, %s818_s14, %s27_s30  }
  0x15   : > { %p918_p7 = por %p106_p2, %p34_p13  ;;  %s149_s6 = sand.u32 1, %s818_s14  }
  0x16   : > { %s594_s7 = sshll.u32 %s822_s15, 8  ;;  %s550_s8 = sshll.u32 %s149_s6, 8 }
  0x17   : > { %s158_s11 = scalar_lea.hbm %s1101_s0, %s594_s7  ;;  %s153_s20 = scalar_lea.vmem [#allocation2], %s550_s8 }
  0x18   : > { %s159_s17 = sshll.u32 %s158_s11, 4  ;;  %s161_s21 = sshll.u32 %s153_s20, 4  ;;  %s160_s17 = int_to_ptr.hbm [resolvable:$true] %s159_s17  ;;  %s162_s21 = int_to_ptr.vmem [resolvable:$true] %s161_s21 }
  0x19   : > { %p929_p9 = pnand %p649_p3, %p36_p5  ;;  %s150_s24 = scalar_lea.sflag [#allocation3], %s149_s6 }
  0x1a   : > { %s722_s25 = sshra.s32 %s160_s17, 4  ;;  %s729_s30 = scalar_lea.hbm %s1101_s0, 512  ;;  %s723_s25 = int_to_ptr.hbm [resolvable:$true] %s722_s25 }
  0x1b   : > { %s724_s27 = scalar_lea.hbm %s723_s25, 256  ;;  %p726_p10 = pneg %p929_p9 }
  0x1c   : > { %p725_p2 = scmp.ne.s32.totalorder %s723_s25, %s724_s27  ;;  %p730_p0 = scmp.lt.s32.totalorder %s723_s25, %s1101_s0 }
  0x1d   : > { %p731_p3 = scmp.lt.s32.totalorder %s729_s30, %s724_s27 }
  0x1e   : > { %p727_p12 = pnand %p726_p10, %p725_p2 }
  0x1f   : > { %p732_p5 = por %p731_p3, %p730_p0 }
  0x20   : > { %p728_p13 = pneg %p727_p12 }
  0x22   : > { %p733_p11 = pnand %p732_p5, %p728_p13 }
  0x24   : > { %736 = shalt.err (!%p733_p11)
}
  0x25   : > { %s827_s6 = smov 128   ;;  %s828_s9 = smov 8  }
  0x26   : > { %643 = dma.hbm_to_vmem [thread:$0]  (!%p929_p9), %s160_s17, 4096, %s162_s21, %s150_s24, %s827_s6, %s827_s6, %s828_s9  }
  0x27   : > { %173 = sbr.rel (%p894_p8) target bundleno = 275 (0x113), region = 32  ;;  %s946_s10 = sand.u32 (!%p894_p8), 1, %s814_s13  }
  0x28   : > { %s554_s11 = sshll.u32 (!%p894_p8), %s946_s10, 8  ;;  %s176_s20 = scalar_lea.sflag (!%p894_p8), [#allocation3], %s946_s10 }
  0x29   : > { %s952_s25 = scalar_lea.vmem (!%p894_p8), [#allocation2], %s554_s11 }
  0x2c   : > { %797 = dma.done.wait (%p881_p4), %s176_s20, 4096  }
  0x2d   : > { %799 = vsyncadd (%p881_p4), %s176_s20, 4294963200 }
  0x2e   : > { %801 = dma.done.wait (%p41_p1), [#allocation6], 1024  }
  0x2f   : > { %803 = vsyncadd (%p41_p1), [#allocation6], 4294966272  ;;  %v602_v0 = vld [vmem:[#allocation5 + $0x38] sm:$0xff]  ;;  %v601_v1 = vld [vmem:[#allocation5 + $0x30] sm:$0xff]  ;;  %s1003_s17 = scalar_lea.vmem [#allocation7], %s554_s11  ;;  %s603_s21 = sshll.u32 %s872_s16, 8 }
  0x30   : > { %326 = vmatpush.bf16.msra.mxu0 %v602_v0  ;;  %604 = vmatpush.bf16.msra.mxu1 %v602_v0  ;;  %v600_v2 = vld [vmem:[#allocation5 + $0x28] sm:$0xff]  ;;  %v599_v3 = vld [vmem:[#allocation5 + $0x20] sm:$0xff]  ;;  %v598_v4 = vld [vmem:[#allocation5 + $0x18] sm:$0xff]  ;;  %s459_s27 = scalar_lea.hbm %s1104_s3, %s603_s21  ;;  %s460_s16 = sshll.u32 %s1003_s17, 4  ;;  %s461_s16 = int_to_ptr.vmem [resolvable:$true] %s460_s16 }
  0x31   : > { %605 = vmatpush.bf16.msra.mxu2 %v602_v0  ;;  %606 = vmatpush.bf16.msra.mxu3 %v602_v0  ;;  %v597_v5 = vld [vmem:[#allocation5 + $0x10] sm:$0xff]  ;;  %v596_v6 = vld [vmem:[#allocation5 + $0x8] sm:$0xff]  ;;  %v595_v7 = vld [vmem:[#allocation5] sm:$0xff]  ;;  %s462_s28 = sshll.u32 %s459_s27, 4  ;;  %s448_s29 = scalar_lea.sflag [#allocation4], %s946_s10  ;;  %s463_s28 = int_to_ptr.hbm [resolvable:$true] %s462_s28 }
  0x32   : > { %v210_v8 = vld [vmem:[%s952_s25] sm:$0xff]  ;;  %v211_v9 = vld [vmem:[%s952_s25 + $0x8] sm:$0xff]  ;;  %v212_v20 = vld [vmem:[%s952_s25 + $0x10] sm:$0xff]  ;;  %s766_s30 = sshra.s32 %s463_s28, 4  ;;  %s772_s9 = scalar_lea.hbm %s1104_s3, 512  ;;  %s767_s30 = int_to_ptr.hbm [resolvable:$true] %s766_s30 }
  0x33   : > { %v218_v10 = vld [vmem:[%s952_s25 + $0x40] sm:$0xff]  ;;  %v219_v11 = vld [vmem:[%s952_s25 + $0x48] sm:$0xff]  ;;  %v242_v16 = vpack.c.bf16 %v211_v9, %v210_v8  ;;  %v213_v21 = vld [vmem:[%s952_s25 + $0x18] sm:$0xff]  ;;  %s768_s7 = scalar_lea.hbm %s767_s30, 256  ;;  %p773_p11 = scmp.lt.s32.totalorder %s767_s30, %s1104_s3 }
  0x34   : > { %327 = vmatpush.bf16.msra.mxu0 %v601_v1  ;;  %607 = vmatpush.bf16.msra.mxu1 %v601_v1  ;;  %v226_v12 = vld [vmem:[%s952_s25 + $0x80] sm:$0xff]  ;;  %v227_v13 = vld [vmem:[%s952_s25 + $0x88] sm:$0xff]  ;;  %v246_v17 = vpack.c.bf16 %v219_v11, %v218_v10  ;;  %v220_v22 = vld [vmem:[%s952_s25 + $0x50] sm:$0xff]  ;;  %v243_v28 = vpack.c.bf16 %v213_v21, %v212_v20  ;;  %p769_p1 = scmp.ne.s32.totalorder %s767_s30, %s768_s7  ;;  %p774_p9 = scmp.lt.s32.totalorder %s772_s9, %s768_s7 }
  0x35   : > { %608 = vmatpush.bf16.msra.mxu2 %v601_v1  ;;  %609 = vmatpush.bf16.msra.mxu3 %v601_v1  ;;  %v234_v14 = vld [vmem:[%s952_s25 + $0xc0] sm:$0xff]  ;;  %v235_v15 = vld [vmem:[%s952_s25 + $0xc8] sm:$0xff]  ;;  %v250_v18 = vpack.c.bf16 %v227_v13, %v226_v12  ;;  %v221_v23 = vld [vmem:[%s952_s25 + $0x58] sm:$0xff] }
  0x36   : > { %v254_v19 = vpack.c.bf16 %v235_v15, %v234_v14  ;;  %v228_v24 = vld [vmem:[%s952_s25 + $0x90] sm:$0xff]  ;;  %v229_v25 = vld [vmem:[%s952_s25 + $0x98] sm:$0xff]  ;;  %v247_v29 = vpack.c.bf16 %v221_v23, %v220_v22  ;;  %v214_v32 = vld [vmem:[%s952_s25 + $0x20] sm:$0xff]  ;;  %p770_p4 = pnand %p769_p1, %p918_p7  ;;  %p775_p2 = por %p774_p9, %p773_p11 }
  0x37   : > { %v236_v26 = vld [vmem:[%s952_s25 + $0xd0] sm:$0xff]  ;;  %v237_v27 = vld [vmem:[%s952_s25 + $0xd8] sm:$0xff]  ;;  %v251_v30 = vpack.c.bf16 %v229_v25, %v228_v24  ;;  %v215_v33 = vld [vmem:[%s952_s25 + $0x28] sm:$0xff] }
  0x38   : > { %328 = vmatpush.bf16.msra.mxu0 %v600_v2  ;;  %610 = vmatpush.bf16.msra.mxu1 %v600_v2  ;;  %v255_v31 = vpack.c.bf16 %v237_v27, %v236_v26  ;;  %v222_v34 = vld [vmem:[%s952_s25 + $0x60] sm:$0xff]  ;;  %v223_v35 = vld [vmem:[%s952_s25 + $0x68] sm:$0xff]  ;;  %v244_v40 = vpack.c.bf16 %v215_v33, %v214_v32  ;;  %v216_v44 = vld [vmem:[%s952_s25 + $0x30] sm:$0xff]  ;;  %p771_p8 = pneg %p770_p4 }
  0x39   : > { %611 = vmatpush.bf16.msra.mxu2 %v600_v2  ;;  %612 = vmatpush.bf16.msra.mxu3 %v600_v2  ;;  %v230_v36 = vld [vmem:[%s952_s25 + $0xa0] sm:$0xff]  ;;  %v231_v37 = vld [vmem:[%s952_s25 + $0xa8] sm:$0xff]  ;;  %v248_v41 = vpack.c.bf16 %v223_v35, %v222_v34  ;;  %v217_v45 = vld [vmem:[%s952_s25 + $0x38] sm:$0xff] }
  0x3a   : > { %v238_v38 = vld [vmem:[%s952_s25 + $0xe0] sm:$0xff]  ;;  %v239_v39 = vld [vmem:[%s952_s25 + $0xe8] sm:$0xff]  ;;  %v252_v42 = vpack.c.bf16 %v231_v37, %v230_v36  ;;  %v224_v46 = vld [vmem:[%s952_s25 + $0x70] sm:$0xff]  ;;  %v245_v52 = vpack.c.bf16 %v217_v45, %v216_v44  ;;  %p776_p10 = pnand %p775_p2, %p771_p8 }
  0x3b   : > { %v256_v43 = vpack.c.bf16 %v239_v39, %v238_v38  ;;  %v225_v47 = vld [vmem:[%s952_s25 + $0x78] sm:$0xff]  ;;  %v232_v48 = vld [vmem:[%s952_s25 + $0xb0] sm:$0xff]  ;;  %v997_v56 = vld [vmem:[%s1103_s2] ss:$0 sm:$0xff] }
  0x3c   : > { %329 = vmatpush.bf16.msra.mxu0 %v599_v3  ;;  %613 = vmatpush.bf16.msra.mxu1 %v599_v3  ;;  %v233_v49 = vld [vmem:[%s952_s25 + $0xb8] sm:$0xff]  ;;  %v240_v50 = vld [vmem:[%s952_s25 + $0xf0] sm:$0xff]  ;;  %v249_v53 = vpack.c.bf16 %v225_v47, %v224_v46 }
  0x3d   : > { %614 = vmatpush.bf16.msra.mxu2 %v599_v3  ;;  %615 = vmatpush.bf16.msra.mxu3 %v599_v3  ;;  %v241_v51 = vld [vmem:[%s952_s25 + $0xf8] sm:$0xff]  ;;  %v253_v54 = vpack.c.bf16 %v233_v49, %v232_v48 }
  0x3e   : > { %v257_v55 = vpack.c.bf16 %v241_v51, %v240_v50 }
  0x40   : > { %330 = vmatpush.bf16.msra.mxu0 %v598_v4  ;;  %616 = vmatpush.bf16.msra.mxu1 %v598_v4 }
  0x41   : > { %617 = vmatpush.bf16.msra.mxu2 %v598_v4  ;;  %618 = vmatpush.bf16.msra.mxu3 %v598_v4 }
  0x44   : > { %331 = vmatpush.bf16.msra.mxu0 %v597_v5  ;;  %619 = vmatpush.bf16.msra.mxu1 %v597_v5 }
  0x45   : > { %620 = vmatpush.bf16.msra.mxu2 %v597_v5  ;;  %621 = vmatpush.bf16.msra.mxu3 %v597_v5 }
  0x48   : > { %332 = vmatpush.bf16.msra.mxu0 %v596_v6  ;;  %622 = vmatpush.bf16.msra.mxu1 %v596_v6 }
  0x49   : > { %623 = vmatpush.bf16.msra.mxu2 %v596_v6  ;;  %624 = vmatpush.bf16.msra.mxu3 %v596_v6 }
  0x4c   : > { %333 = vmatpush.bf16.msra.mxu0 %v595_v7  ;;  %625 = vmatpush.bf16.msra.mxu1 %v595_v7 }
  0x4d   : > { %626 = vmatpush.bf16.msra.mxu2 %v595_v7  ;;  %627 = vmatpush.bf16.msra.mxu3 %v595_v7 }
  0x4f   : > { %334 = vmatmul.bf16.vlgmr.msra.gmra.mxu0 %v242_v16  ;;  %354 = vmatmul.bf16.vlgmr.msra.gmra.mxu1 %v246_v17 }
  0x50   : > { %374 = vmatmul.bf16.vlgmr.msra.gmra.mxu2 %v250_v18  ;;  %394 = vmatmul.bf16.vlgmr.msra.gmra.mxu3 %v254_v19 }
  0x5f   : > { %339 = vmatmul.bf16.gmra.mxu0 %v243_v28  ;;  %359 = vmatmul.bf16.gmra.mxu1 %v247_v29 }
  0x60   : > { %379 = vmatmul.bf16.gmra.mxu2 %v251_v30  ;;  %399 = vmatmul.bf16.gmra.mxu3 %v255_v31 }
  0x6f   : > { %344 = vmatmul.bf16.gmra.mxu0 %v244_v40  ;;  %364 = vmatmul.bf16.gmra.mxu1 %v248_v41 }
  0x70   : > { %384 = vmatmul.bf16.gmra.mxu2 %v252_v42  ;;  %404 = vmatmul.bf16.gmra.mxu3 %v256_v43 }
  0x7f   : > { %349 = vmatmul.bf16.gmra.mxu0 %v245_v52  ;;  %369 = vmatmul.bf16.gmra.mxu1 %v249_v53 }
  0x80   : > { %389 = vmatmul.bf16.gmra.mxu2 %v253_v54  ;;  %409 = vmatmul.bf16.gmra.mxu3 %v257_v55 }
  0xcc   : > { %v335_v57 = vpop.f32.mrf.mxu0  ;;  %v355_v58 = vpop.f32.mrf.mxu1 }
  0xcd   : > { %v336_v59 = vadd.f32 %v997_v56, %v335_v57  ;;  %v356_v60 = vadd.f32 %v997_v56, %v355_v58 }
  0xcf   : > { %415 = vst [vmem:[%s1003_s17] sm:$0xff] %v336_v59 }
  0xd0   : > { %423 = vst [vmem:[%s1003_s17 + $0x40] sm:$0xff] %v356_v60 }
  0xd3   : > { %v375_v61 = vpop.f32.mrf.mxu2  ;;  %v395_v62 = vpop.f32.mrf.mxu3 }
  0xd4   : > { %v376_v63 = vadd.f32 %v997_v56, %v375_v61  ;;  %v396_v0 = vadd.f32 %v997_v56, %v395_v62  ;;  %v337_v1 = vpop.f32.mrf.mxu0  ;;  %v357_v2 = vpop.f32.mrf.mxu1 }
  0xd5   : > { %v338_v3 = vadd.f32 %v997_v56, %v337_v1  ;;  %v358_v4 = vadd.f32 %v997_v56, %v357_v2 }
  0xd6   : > { %431 = vst [vmem:[%s1003_s17 + $0x80] sm:$0xff] %v376_v63 }
  0xd7   : > { %439 = vst [vmem:[%s1003_s17 + $0xc0] sm:$0xff] %v396_v0 }
  0xd8   : > { %416 = vst [vmem:[%s1003_s17 + $0x8] sm:$0xff] %v338_v3 }
  0xd9   : > { %424 = vst [vmem:[%s1003_s17 + $0x48] sm:$0xff] %v358_v4 }
  0xdb   : > { %v377_v5 = vpop.f32.mrf.mxu2  ;;  %v397_v6 = vpop.f32.mrf.mxu3 }
  0xdc   : > { %v378_v7 = vadd.f32 %v997_v56, %v377_v5  ;;  %v398_v8 = vadd.f32 %v997_v56, %v397_v6  ;;  %v340_v9 = vpop.f32.mrf.mxu0  ;;  %v360_v10 = vpop.f32.mrf.mxu1 }
  0xdd   : > { %v341_v11 = vadd.f32 %v997_v56, %v340_v9  ;;  %v361_v12 = vadd.f32 %v997_v56, %v360_v10 }
  0xde   : > { %432 = vst [vmem:[%s1003_s17 + $0x88] sm:$0xff] %v378_v7 }
  0xdf   : > { %440 = vst [vmem:[%s1003_s17 + $0xc8] sm:$0xff] %v398_v8 }
  0xe0   : > { %417 = vst [vmem:[%s1003_s17 + $0x10] sm:$0xff] %v341_v11 }
  0xe1   : > { %425 = vst [vmem:[%s1003_s17 + $0x50] sm:$0xff] %v361_v12 }
  0xe3   : > { %v380_v13 = vpop.f32.mrf.mxu2  ;;  %v400_v14 = vpop.f32.mrf.mxu3 }
  0xe4   : > { %v381_v15 = vadd.f32 %v997_v56, %v380_v13  ;;  %v401_v16 = vadd.f32 %v997_v56, %v400_v14  ;;  %v342_v17 = vpop.f32.mrf.mxu0  ;;  %v362_v18 = vpop.f32.mrf.mxu1 }
  0xe5   : > { %v343_v19 = vadd.f32 %v997_v56, %v342_v17  ;;  %v363_v20 = vadd.f32 %v997_v56, %v362_v18 }
  0xe6   : > { %433 = vst [vmem:[%s1003_s17 + $0x90] sm:$0xff] %v381_v15 }
  0xe7   : > { %441 = vst [vmem:[%s1003_s17 + $0xd0] sm:$0xff] %v401_v16 }
  0xe8   : > { %418 = vst [vmem:[%s1003_s17 + $0x18] sm:$0xff] %v343_v19 }
  0xe9   : > { %426 = vst [vmem:[%s1003_s17 + $0x58] sm:$0xff] %v363_v20 }
  0xeb   : > { %v382_v21 = vpop.f32.mrf.mxu2  ;;  %v402_v22 = vpop.f32.mrf.mxu3 }
  0xec   : > { %v383_v23 = vadd.f32 %v997_v56, %v382_v21  ;;  %v403_v24 = vadd.f32 %v997_v56, %v402_v22  ;;  %v345_v25 = vpop.f32.mrf.mxu0  ;;  %v365_v26 = vpop.f32.mrf.mxu1 }
  0xed   : > { %v346_v27 = vadd.f32 %v997_v56, %v345_v25  ;;  %v366_v28 = vadd.f32 %v997_v56, %v365_v26 }
  0xee   : > { %434 = vst [vmem:[%s1003_s17 + $0x98] sm:$0xff] %v383_v23 }
  0xef   : > { %442 = vst [vmem:[%s1003_s17 + $0xd8] sm:$0xff] %v403_v24 }
  0xf0   : > { %419 = vst [vmem:[%s1003_s17 + $0x20] sm:$0xff] %v346_v27 }
  0xf1   : > { %427 = vst [vmem:[%s1003_s17 + $0x60] sm:$0xff] %v366_v28 }
  0xf3   : > { %v385_v29 = vpop.f32.mrf.mxu2  ;;  %v405_v30 = vpop.f32.mrf.mxu3 }
  0xf4   : > { %v386_v31 = vadd.f32 %v997_v56, %v385_v29  ;;  %v406_v32 = vadd.f32 %v997_v56, %v405_v30  ;;  %v347_v33 = vpop.f32.mrf.mxu0  ;;  %v367_v34 = vpop.f32.mrf.mxu1 }
  0xf5   : > { %v348_v35 = vadd.f32 %v997_v56, %v347_v33  ;;  %v368_v36 = vadd.f32 %v997_v56, %v367_v34 }
  0xf6   : > { %435 = vst [vmem:[%s1003_s17 + $0xa0] sm:$0xff] %v386_v31 }
  0xf7   : > { %443 = vst [vmem:[%s1003_s17 + $0xe0] sm:$0xff] %v406_v32 }
  0xf8   : > { %420 = vst [vmem:[%s1003_s17 + $0x28] sm:$0xff] %v348_v35 }
  0xf9   : > { %428 = vst [vmem:[%s1003_s17 + $0x68] sm:$0xff] %v368_v36 }
  0xfb   : > { %v387_v37 = vpop.f32.mrf.mxu2  ;;  %v407_v38 = vpop.f32.mrf.mxu3 }
  0xfc   : > { %v388_v39 = vadd.f32 %v997_v56, %v387_v37  ;;  %v408_v40 = vadd.f32 %v997_v56, %v407_v38  ;;  %v350_v41 = vpop.f32.mrf.mxu0  ;;  %v370_v42 = vpop.f32.mrf.mxu1 }
  0xfd   : > { %v351_v43 = vadd.f32 %v997_v56, %v350_v41  ;;  %v371_v44 = vadd.f32 %v997_v56, %v370_v42 }
  0xfe   : > { %436 = vst [vmem:[%s1003_s17 + $0xa8] sm:$0xff] %v388_v39 }
  0xff   : > { %444 = vst [vmem:[%s1003_s17 + $0xe8] sm:$0xff] %v408_v40 }
 0x100   : > { %421 = vst [vmem:[%s1003_s17 + $0x30] sm:$0xff] %v351_v43 }
 0x101   : > { %429 = vst [vmem:[%s1003_s17 + $0x70] sm:$0xff] %v371_v44 }
 0x103   : > { %v390_v45 = vpop.f32.mrf.mxu2  ;;  %v410_v46 = vpop.f32.mrf.mxu3 }
 0x104   : > { %v391_v47 = vadd.f32 %v997_v56, %v390_v45  ;;  %v411_v48 = vadd.f32 %v997_v56, %v410_v46  ;;  %v352_v49 = vpop.f32.mrf.mxu0  ;;  %v372_v50 = vpop.f32.mrf.mxu1 }
 0x105   : > { %v353_v51 = vadd.f32 %v997_v56, %v352_v49  ;;  %v373_v52 = vadd.f32 %v997_v56, %v372_v50 }
 0x106   : > { %437 = vst [vmem:[%s1003_s17 + $0xb0] sm:$0xff] %v391_v47 }
 0x107   : > { %445 = vst [vmem:[%s1003_s17 + $0xf0] sm:$0xff] %v411_v48 }
 0x108   : > { %422 = vst [vmem:[%s1003_s17 + $0x38] sm:$0xff] %v353_v51 }
 0x109   : > { %430 = vst [vmem:[%s1003_s17 + $0x78] sm:$0xff] %v373_v52 }
 0x10b   : > { %v392_v53 = vpop.f32.mrf.mxu2  ;;  %v412_v54 = vpop.f32.mrf.mxu3 }
 0x10c   : > { %v393_v55 = vadd.f32 %v997_v56, %v392_v53  ;;  %v413_v57 = vadd.f32 %v997_v56, %v412_v54 }
 0x10e   : > { %438 = vst [vmem:[%s1003_s17 + $0xb8] sm:$0xff] %v393_v55 }
 0x10f   : > { %446 = vst [vmem:[%s1003_s17 + $0xf8] sm:$0xff] %v413_v57 }
 0x110   : > { %779 = shalt.err (!%p776_p10)
}
 0x111   : > { %s829_s10 = smov 128   ;;  %s830_s25 = smov 8  }
 0x112   : > { %634 = dma.vmem_to_hbm [thread:$0]  (%p918_p7), %s461_s16, 4096, %s463_s28, %s448_s29, %s829_s10, %s829_s10, %s830_s25  }
 0x113 PF: > { %s477_s18 = sand.u32 1, %s810_s12   ;;  %p1110_p12 = scmp.ge.s32.totalorder %s822_s15, 2 }
 0x114   : > { %s478_s23 = scalar_lea.sflag [#allocation4], %s477_s18 }
 0x115   : > { %p645_p13 = pnand %p1110_p12, %p886_p6 }
 0x117   : > { %p646_p0 = pneg %p645_p13 }
 0x119   : > { %805 = dma.done.wait (%p646_p0), %s478_s23, 4096  }
 0x11a   : > { %807 = vsyncadd (%p646_p0), %s478_s23, 4294963200  ;;  %p17_p3 = scmp.ge.s32.totalorder %s904_s26, 4   ;;  %s1111_s12 = smov %s814_s13 }
 0x11b   : > { %s1112_s13 = smov %s818_s14  ;;  %s1113_s14 = smov %s914_s4 }
 0x11c   : > { %s1114_s15 = smov %s904_s26  ;;  %19 = sbr.rel (!%p17_p3) target bundleno = 6 (0x6), region = 81 }
 0x121   :  { %484 = vsyncpa [#allocation3], 1 }
 0x122   :  { %486 = vsyncpa [#allocation3 + $0x1], 1 }
 0x123   :  { %487 = vsyncpa [#allocation6], 1 }
 0x124   :  { %488 = vsyncpa [#allocation4], 1 }
 0x125   :  { %490 = vsyncpa [#allocation4 + $0x1], 1 }

</bundles_post_ra>
